<compile_context>
chip_gen: v7x
topology: tpu7x:2x2x1
jax: 0.10.0
libtpu: 0.0.40
codegen_flags: <defaults>
</compile_context>

<pallas_src>
import math
import functools

import jax
import jax.numpy as jnp
from jax.experimental import pallas as pl
from jax.experimental.pallas import tpu as pltpu

LN_EPS = 1e-5  # torch.nn.LayerNorm default


# --------------------------------------------------------------------------
# Kernel 1: LayerNorm1 + QKV projection (Q columns pre-scaled by 1/sqrt(hd))
# --------------------------------------------------------------------------
def _ln_qkv_kernel(x_ref, ln_w_ref, ln_b_ref, w_ref, b_ref, out_ref):
    x = x_ref[0]                                           # (tile, C) f32
    mu = jnp.mean(x, axis=-1, keepdims=True)
    var = jnp.mean((x - mu) ** 2, axis=-1, keepdims=True)
    h = (x - mu) * jax.lax.rsqrt(var + LN_EPS) * ln_w_ref[...] + ln_b_ref[...]
    qkv = jnp.dot(h.astype(jnp.bfloat16), w_ref[...],
                  preferred_element_type=jnp.float32) + b_ref[...]
    out_ref[0] = qkv.astype(out_ref.dtype)                 # (tile, 3C) bf16


# --------------------------------------------------------------------------
# Kernel 2: causal flash attention + proj + residual + LN2 + MLP + residual
# --------------------------------------------------------------------------
def _attn_mlp_kernel(x_ref, q_ref, k_ref, v_ref,
                     wp_ref, bp_ref, ln2_w_ref, ln2_b_ref,
                     w_fc_ref, b_fc_ref, w_mp_ref, b_mp_ref,
                     out_ref,
                     m_scr, l_scr, acc_scr,
                     *, n_head, tq):
    C = x_ref.shape[2]
    qi = pl.program_id(1)
    NEG = -1e30

    # online-softmax state (re-initialized every grid step -> no carry)
    m_scr[...] = jnp.full(m_scr.shape, -jnp.inf, jnp.float32)
    l_scr[...] = jnp.zeros(l_scr.shape, jnp.float32)
    acc_scr[...] = jnp.zeros(acc_scr.shape, jnp.float32)

    q = q_ref[0]                                           # (nh, tq, hd) bf16, pre-scaled
    # diagonal-tile causal mask, hoisted out of the key loop
    diag = (jax.lax.broadcasted_iota(jnp.int32, (1, tq, tq), 1) >=
            jax.lax.broadcasted_iota(jnp.int32, (1, tq, tq), 2))

    # Causal bound: only key tiles 0..qi are ever visible to this query tile.
    @pl.loop(0, qi + 1)
    def _(kv):
        k0 = pl.multiple_of(kv * tq, tq)
        k_t = k_ref[0, :, pl.ds(k0, tq), :]                # (nh, tq, hd) bf16
        v_t = v_ref[0, :, pl.ds(k0, tq), :]                # (nh, tq, hd) bf16
        s = jnp.einsum('hqd,hkd->hqk', q, k_t,
                       preferred_element_type=jnp.float32)  # (nh, tq, tq) f32
        # tiles strictly below the diagonal are fully visible; mask only kv==qi
        s = jnp.where(jnp.logical_or(kv < qi, diag), s, NEG)
        m_new = jnp.maximum(m_scr[...], jnp.max(s, axis=-1, keepdims=True))
        alpha = jnp.exp(m_scr[...] - m_new)
        p = jnp.exp(s - m_new)
        l_scr[...] = alpha * l_scr[...] + jnp.sum(p, axis=-1, keepdims=True)
        acc_scr[...] = alpha * acc_scr[...] + jnp.einsum(
            'hqk,hkd->hqd', p.astype(jnp.bfloat16), v_t,
            preferred_element_type=jnp.float32)
        m_scr[...] = m_new

    # per-head contexts -> bf16 (single cast; no f32 scratch round-trip)
    y = (acc_scr[...] * pl.reciprocal(l_scr[...], approx=True)
         ).astype(jnp.bfloat16)                            # (nh, tq, hd)

    # output projection: sum_h y_h @ Wp_h with Wp head-major (nh, hd, C).
    # Only leading-dim (head) indexing -> lane-dense loads/stores throughout.
    attn = jnp.zeros((tq, C), jnp.float32)
    for h in range(n_head):
        attn = attn + jnp.dot(y[h], wp_ref[h],
                              preferred_element_type=jnp.float32)
    attn = attn + bp_ref[...]

    x1 = x_ref[0] + attn                                   # residual 1 (f32)

    # ---- MLP branch ----
    mu = jnp.mean(x1, axis=-1, keepdims=True)
    var = jnp.mean((x1 - mu) ** 2, axis=-1, keepdims=True)
    h2 = (x1 - mu) * jax.lax.rsqrt(var + LN_EPS) * ln2_w_ref[...] + ln2_b_ref[...]
    u = jnp.dot(h2.astype(jnp.bfloat16), w_fc_ref[...],
                preferred_element_type=jnp.float32) + b_fc_ref[...]   # (tq, 4C)
    c0 = math.sqrt(2.0 / math.pi)                          # GELU tanh approx
    g = 0.5 * u * (1.0 + jnp.tanh(c0 * (u + 0.044715 * u * u * u)))
    mlp = jnp.dot(g.astype(jnp.bfloat16), w_mp_ref[...],
                  preferred_element_type=jnp.float32) + b_mp_ref[...]  # (tq, C)
    out_ref[0] = (x1 + mlp).astype(out_ref.dtype)          # residual 2


# --------------------------------------------------------------------------
# Wrapper helpers
# --------------------------------------------------------------------------
def _pick_tile(T):
    """Generation-dependent query tile: 256 on v6e/v7x, 128 on v5e/older."""
    kind = ""
    try:
        kind = jax.devices()[0].device_kind.lower()
    except Exception:
        pass
    pref = 256 if ("v6" in kind or "v7" in kind) else 128
    for cand in (pref, 128, 64, 32, 16, 8):
        if cand <= T and T % cand == 0:
            return cand
    return T


def _estimate_main_vmem(T, C, nh, hd, tq, single_buffer_weights):
    """Rough resident-VMEM estimate for the attention+MLP kernel (bytes)."""
    lane = lambda n: ((n + 127) // 128) * 128
    sub = lambda n: ((n + 7) // 8) * 8
    BF, F4 = 2, 4
    wbuf = 1 if single_buffer_weights else 2
    est = 0
    est += 2 * sub(tq) * lane(C) * F4                      # x block (x2 buf)
    est += 2 * nh * sub(tq) * lane(hd) * BF                # q tile (x2 buf)
    est += 2 * 2 * nh * sub(T) * lane(hd) * BF             # k + v (x2 buf)
    est += 2 * sub(tq) * lane(C) * F4                      # out block (x2 buf)
    est += wbuf * (nh * sub(hd) * lane(C) + sub(C) * lane(4 * C)
                   + sub(4 * C) * lane(C)) * BF            # weights
    est += wbuf * 6 * 8 * lane(4 * C) * F4                 # biases / LN params
    est += (2 * nh * sub(tq) * 128 + nh * sub(tq) * lane(hd)) * F4  # scratch
    est += nh * sub(tq) * lane(tq) * F4                    # live score tile
    est += sub(tq) * lane(4 * C) * F4                      # MLP hidden
    return est


def _maybe_vmem_limit(est_bytes):
    """Only raise the scoped-VMEM limit when needed; never request ~all of
    physical VMEM (v7x only has 64 MiB per TensorCore)."""
    default_limit = 32 * 1024 * 1024
    if est_bytes <= default_limit - (4 << 20):
        return None
    try:
        phys = pltpu.get_tpu_info().vmem_capacity_bytes
    except Exception:
        phys = 128 * 1024 * 1024
    return int(min(est_bytes + (8 << 20), phys * 3 // 4))


def _gpt2_block_impl(x, params, n_head, tq, single_buffer_weights):
    B, T, C = x.shape
    assert C % n_head == 0
    hd = C // n_head
    if tq is None:
        tq = _pick_tile(T)
    assert T % tq == 0 and (tq == T or tq % 8 == 0)
    nq = T // tq
    bf = jnp.bfloat16

    # fold the softmax 1/sqrt(hd) scale into the Q columns of the projection
    scale = 1.0 / math.sqrt(hd)
    col_scale = jnp.concatenate(
        [jnp.full((C,), scale, jnp.float32), jnp.ones((2 * C,), jnp.float32)])
    w_qkv = (params["w_qkv"] * col_scale[None, :]).astype(bf)
    b_qkv = params["b_qkv"] * col_scale[None, :]

    def const_spec(shape):
        idx = lambda b_, i_, _n=len(shape): (0,) * _n
        if single_buffer_weights:
            # constant index_map -> no need for prefetch double buffering
            return pl.BlockSpec(shape, idx, pipeline_mode=pl.Buffered(1))
        return pl.BlockSpec(shape, idx)

    # ---- kernel 1: LayerNorm1 + QKV projection over the whole sequence ----
    qkv = pl.pallas_call(
        _ln_qkv_kernel,
        out_shape=jax.ShapeDtypeStruct((B, T, 3 * C), bf),
        grid=(B, nq),
        in_specs=[
            pl.BlockSpec((1, tq, C), lambda b_, i_: (b_, i_, 0)),
            const_spec((1, C)), const_spec((1, C)),
            const_spec((C, 3 * C)), const_spec((1, 3 * C)),
        ],
        out_specs=pl.BlockSpec((1, tq, 3 * C), lambda b_, i_: (b_, i_, 0)),
        compiler_params=pltpu.CompilerParams(
            dimension_semantics=("parallel", "parallel")),
    )(x, params["ln1_w"], params["ln1_b"], w_qkv, b_qkv)

    # head-major (B, nh, T, hd) layout: pure XLA layout shuffle on bf16 data
    q, k, v = jnp.split(qkv, 3, axis=-1)

    def to_heads(a):
        return a.reshape(B, T, n_head, hd).transpose(0, 2, 1, 3)

    q, k, v = to_heads(q), to_heads(k), to_heads(v)

    w_attn_proj = params["w_attn_proj"].reshape(n_head, hd, C).astype(bf)
    w_fc = params["w_fc"].astype(bf)
    w_mlp_proj = params["w_mlp_proj"].astype(bf)

    cp = dict(dimension_semantics=("parallel", "parallel"))
    vl = _maybe_vmem_limit(
        _estimate_main_vmem(T, C, n_head, hd, tq, single_buffer_weights))
    if vl is not None:
        cp["vmem_limit_bytes"] = vl

    # ---- kernel 2: causal attention + proj + residual + LN2 + MLP ----
    return pl.pallas_call(
        functools.partial(_attn_mlp_kernel, n_head=n_head, tq=tq),
        out_shape=jax.ShapeDtypeStruct((B, T, C), x.dtype),
        grid=(B, nq),
        in_specs=[
            pl.BlockSpec((1, tq, C), lambda b_, i_: (b_, i_, 0)),            # x
            pl.BlockSpec((1, n_head, tq, hd), lambda b_, i_: (b_, 0, i_, 0)),  # Q tile
            pl.BlockSpec((1, n_head, T, hd), lambda b_, i_: (b_, 0, 0, 0)),    # K (seq)
            pl.BlockSpec((1, n_head, T, hd), lambda b_, i_: (b_, 0, 0, 0)),    # V (seq)
            const_spec((n_head, hd, C)),                                       # attn proj W
            const_spec((1, C)),                                                # attn proj b
            const_spec((1, C)), const_spec((1, C)),                            # ln2 w, b
            const_spec((C, 4 * C)), const_spec((1, 4 * C)),                    # fc W, b
            const_spec((4 * C, C)), const_spec((1, C)),                        # mlp proj W, b
        ],
        out_specs=pl.BlockSpec((1, tq, C), lambda b_, i_: (b_, i_, 0)),
        scratch_shapes=[
            pltpu.VMEM((n_head, tq, 1), jnp.float32),   # running max
            pltpu.VMEM((n_head, tq, 1), jnp.float32),   # running denom
            pltpu.VMEM((n_head, tq, hd), jnp.float32),  # context accumulator
        ],
        compiler_params=pltpu.CompilerParams(**cp),
    )(x, q, k, v,
      w_attn_proj, params["b_attn_proj"],
      params["ln2_w"], params["ln2_b"],
      w_fc, params["b_fc"],
      w_mlp_proj, params["b_mlp_proj"])


def gpt2_block(x, params, n_head, tq=None):
    try:
        return _gpt2_block_impl(x, params, n_head, tq,
                                single_buffer_weights=True)
    except Exception:
        # pl.Buffered(1) not supported by this jax version -> default buffering
        return _gpt2_block_impl(x, params, n_head, tq,
                                single_buffer_weights=False)


# ---------------- pure-JAX reference (for verification) ----------------
def _reference_block(x, p, n_head):
    def ln(v, w, b):
        mu = jnp.mean(v, axis=-1, keepdims=True)
        var = jnp.mean((v - mu) ** 2, axis=-1, keepdims=True)
        return (v - mu) / jnp.sqrt(var + LN_EPS) * w + b

    B, T, C = x.shape
    hd = C // n_head
    h = ln(x, p["ln1_w"], p["ln1_b"])
    qkv = h @ p["w_qkv"] + p["b_qkv"]
    q, k, v = jnp.split(qkv, 3, axis=-1)
    q = q.reshape(B, T, n_head, hd).transpose(0, 2, 1, 3)
    k = k.reshape(B, T, n_head, hd).transpose(0, 2, 1, 3)
    v = v.reshape(B, T, n_head, hd).transpose(0, 2, 1, 3)
    s = jnp.einsum("bhtd,bhsd->bhts", q, k) / math.sqrt(hd)
    mask = jnp.tril(jnp.ones((T, T), dtype=bool))
    s = jnp.where(mask, s, -jnp.inf)
    a = jax.nn.softmax(s, axis=-1)
    y = jnp.einsum("bhts,bhsd->bhtd", a, v)
    y = y.transpose(0, 2, 1, 3).reshape(B, T, C)
    x = x + (y @ p["w_attn_proj"] + p["b_attn_proj"])
    h2 = ln(x, p["ln2_w"], p["ln2_b"])
    u = h2 @ p["w_fc"] + p["b_fc"]
    g = 0.5 * u * (1.0 + jnp.tanh(math.sqrt(2.0 / math.pi)
                                  * (u + 0.044715 * u ** 3)))
    return x + (g @ p["w_mlp_proj"] + p["b_mlp_proj"])


if __name__ == "__main__":
    # Small GPT config: n_embed=32, n_head=4, B=2, T=16
    B, T, C, NH = 2, 16, 32, 4
    key = jax.random.PRNGKey(0)
    ks = jax.random.split(key, 8)

    x = jax.random.normal(ks[0], (B, T, C), dtype=jnp.float32)

    std = 0.02
    params = {
        # LayerNorm params kept as (1, C) rows so they broadcast over rows.
        "ln1_w": jnp.ones((1, C), jnp.float32),
        "ln1_b": jnp.zeros((1, C), jnp.float32),
        "w_qkv": std * jax.random.normal(ks[1], (C, 3 * C), jnp.float32),
        "b_qkv": jnp.zeros((1, 3 * C), jnp.float32),
        "w_attn_proj": std * jax.random.normal(ks[2], (C, C), jnp.float32),
        "b_attn_proj": jnp.zeros((1, C), jnp.float32),
        "ln2_w": jnp.ones((1, C), jnp.float32),
        "ln2_b": jnp.zeros((1, C), jnp.float32),
        "w_fc": std * jax.random.normal(ks[3], (C, 4 * C), jnp.float32),
        "b_fc": jnp.zeros((1, 4 * C), jnp.float32),
        "w_mlp_proj": std * jax.random.normal(ks[4], (4 * C, C), jnp.float32),
        "b_mlp_proj": jnp.zeros((1, C), jnp.float32),
    }

    out = jax.block_until_ready(gpt2_block(x, params, NH))
    ref = jax.block_until_ready(_reference_block(x, params, NH))

    assert out.shape == (B, T, C)
    # bf16 MXU feeds + bf16 Q/K/V storage + approx reciprocal -> loose-ish tol
    err = float(jnp.max(jnp.abs(out - ref)))
    assert err < 1e-2, f"max abs err {err}"
    print("KERNEL_OK")
</pallas_src>

<mosaic_0001>
module attributes {stable_mosaic.version = 11 : i64} {
  func.func @_ln_qkv_kernel(%arg0: i32, %arg1: i32, %arg2: memref<1x16x32xf32, #tpu.memory_space<vmem>>, %arg3: memref<1x32xf32, #tpu.memory_space<vmem>>, %arg4: memref<1x32xf32, #tpu.memory_space<vmem>>, %arg5: memref<32x96xbf16, #tpu.memory_space<vmem>>, %arg6: memref<1x96xf32, #tpu.memory_space<vmem>>, %arg7: memref<1x16x96xbf16, #tpu.memory_space<vmem>>) attributes {dimension_semantics = [#tpu.dimension_semantics<parallel>, #tpu.dimension_semantics<parallel>], iteration_bounds = array<i64: 2, 1>, scalar_prefetch = 0 : i64, scratch_operands = 0 : i64, tpu.core_type = #tpu.core_type<tc>, window_params = [{transform_indices = @transform_0, window_bounds = array<i64: 1, 16, 32>}, {pipeline_mode = #tpu.pipeline_mode<synchronous>, transform_indices = @transform_1, window_bounds = array<i64: 1, 32>}, {pipeline_mode = #tpu.pipeline_mode<synchronous>, transform_indices = @transform_2, window_bounds = array<i64: 1, 32>}, {pipeline_mode = #tpu.pipeline_mode<synchronous>, transform_indices = @transform_3, window_bounds = array<i64: 32, 96>}, {pipeline_mode = #tpu.pipeline_mode<synchronous>, transform_indices = @transform_4, window_bounds = array<i64: 1, 96>}, {transform_indices = @transform_5, window_bounds = array<i64: 1, 16, 96>}]} {
    %c0 = arith.constant 0 : index
    %c0_0 = arith.constant 0 : index
    %c0_1 = arith.constant 0 : index
    %0 = vector.load %arg2[%c0, %c0_0, %c0_1] : memref<1x16x32xf32, #tpu.memory_space<vmem>>, vector<1x16x32xf32>
    %1 = vector.shape_cast %0 : vector<1x16x32xf32> to vector<16x32xf32>
    %cst = arith.constant dense<0.000000e+00> : vector<16xf32>
    %2 = vector.multi_reduction <add>, %1, %cst [1] : vector<16x32xf32> to vector<16xf32>
    %3 = vector.shape_cast %2 : vector<16xf32> to vector<16x1xf32>
    %cst_2 = arith.constant 3.200000e+01 : f32
    %4 = vector.broadcast %cst_2 : f32 to vector<16x1xf32>
    %5 = arith.divf %3, %4 : vector<16x1xf32>
    %6 = vector.broadcast %5 : vector<16x1xf32> to vector<16x32xf32>
    %7 = arith.subf %1, %6 : vector<16x32xf32>
    %8 = arith.mulf %7, %7 : vector<16x32xf32>
    %cst_3 = arith.constant dense<0.000000e+00> : vector<16xf32>
    %9 = vector.multi_reduction <add>, %8, %cst_3 [1] : vector<16x32xf32> to vector<16xf32>
    %10 = vector.shape_cast %9 : vector<16xf32> to vector<16x1xf32>
    %cst_4 = arith.constant 3.200000e+01 : f32
    %11 = vector.broadcast %cst_4 : f32 to vector<16x1xf32>
    %12 = arith.divf %10, %11 : vector<16x1xf32>
    %13 = vector.broadcast %5 : vector<16x1xf32> to vector<16x32xf32>
    %14 = arith.subf %1, %13 : vector<16x32xf32>
    %cst_5 = arith.constant 9.99999974E-6 : f32
    %15 = vector.broadcast %cst_5 : f32 to vector<16x1xf32>
    %16 = arith.addf %12, %15 : vector<16x1xf32>
    %17 = math.rsqrt %16 : vector<16x1xf32>
    %18 = vector.broadcast %17 : vector<16x1xf32> to vector<16x32xf32>
    %19 = arith.mulf %14, %18 : vector<16x32xf32>
    %c0_6 = arith.constant 0 : index
    %c0_7 = arith.constant 0 : index
    %20 = vector.load %arg3[%c0_6, %c0_7] : memref<1x32xf32, #tpu.memory_space<vmem>>, vector<1x32xf32>
    %21 = vector.broadcast %20 : vector<1x32xf32> to vector<16x32xf32>
    %22 = arith.mulf %19, %21 : vector<16x32xf32>
    %c0_8 = arith.constant 0 : index
    %c0_9 = arith.constant 0 : index
    %23 = vector.load %arg4[%c0_8, %c0_9] : memref<1x32xf32, #tpu.memory_space<vmem>>, vector<1x32xf32>
    %24 = vector.broadcast %23 : vector<1x32xf32> to vector<16x32xf32>
    %25 = arith.addf %22, %24 : vector<16x32xf32>
    %26 = arith.truncf %25 : vector<16x32xf32> to vector<16x32xbf16>
    %c0_10 = arith.constant 0 : index
    %c0_11 = arith.constant 0 : index
    %27 = vector.load %arg5[%c0_10, %c0_11] : memref<32x96xbf16, #tpu.memory_space<vmem>>, vector<32x96xbf16>
    %cst_12 = arith.constant dense<0.000000e+00> : vector<16x96xf32>
    %28 = tpu.matmul %26, %27, %cst_12 {dimension_numbers = #tpu.dot_dimension_numbers<[1], [0], [0], [1], [0, 0, 1, 1], [], []>} : vector<16x32xbf16>, vector<32x96xbf16>, vector<16x96xf32> -> vector<16x96xf32>
    %c0_13 = arith.constant 0 : index
    %c0_14 = arith.constant 0 : index
    %29 = vector.load %arg6[%c0_13, %c0_14] : memref<1x96xf32, #tpu.memory_space<vmem>>, vector<1x96xf32>
    %30 = vector.broadcast %29 : vector<1x96xf32> to vector<16x96xf32>
    %31 = arith.addf %28, %30 : vector<16x96xf32>
    %32 = arith.truncf %31 : vector<16x96xf32> to vector<16x96xbf16>
    %c0_15 = arith.constant 0 : index
    %c0_16 = arith.constant 0 : index
    %c0_17 = arith.constant 0 : index
    %33 = vector.load %arg7[%c0_15, %c0_16, %c0_17] : memref<1x16x96xbf16, #tpu.memory_space<vmem>>, vector<1x16x96xbf16>
    %34 = vector.shape_cast %33 : vector<1x16x96xbf16> to vector<16x96xbf16>
    %35 = vector.shape_cast %32 : vector<16x96xbf16> to vector<1x16x96xbf16>
    tpu.vector_store %arg7[%c0_15, %c0_16, %c0_17], %35 {strides = array<i32>} : memref<1x16x96xbf16, #tpu.memory_space<vmem>>, vector<1x16x96xbf16>,
    return
  }
  func.func @transform_0(%arg0: i32, %arg1: i32) -> (i32, i32, i32) {
    %c0_i32 = arith.constant 0 : i32
    %c0_i32_0 = arith.constant 0 : i32
    return %arg0, %arg1, %c0_i32 : i32, i32, i32
  }
  func.func @transform_1(%arg0: i32, %arg1: i32) -> (i32, i32) {
    %c0_i32 = arith.constant 0 : i32
    %c0_i32_0 = arith.constant 0 : i32
    %c0_i32_1 = arith.constant 0 : i32
    return %c0_i32, %c0_i32_0 : i32, i32
  }
  func.func @transform_2(%arg0: i32, %arg1: i32) -> (i32, i32) {
    %c0_i32 = arith.constant 0 : i32
    %c0_i32_0 = arith.constant 0 : i32
    %c0_i32_1 = arith.constant 0 : i32
    return %c0_i32, %c0_i32_0 : i32, i32
  }
  func.func @transform_3(%arg0: i32, %arg1: i32) -> (i32, i32) {
    %c0_i32 = arith.constant 0 : i32
    %c0_i32_0 = arith.constant 0 : i32
    %c0_i32_1 = arith.constant 0 : i32
    return %c0_i32, %c0_i32_0 : i32, i32
  }
  func.func @transform_4(%arg0: i32, %arg1: i32) -> (i32, i32) {
    %c0_i32 = arith.constant 0 : i32
    %c0_i32_0 = arith.constant 0 : i32
    %c0_i32_1 = arith.constant 0 : i32
    return %c0_i32, %c0_i32_0 : i32, i32
  }
  func.func @transform_5(%arg0: i32, %arg1: i32) -> (i32, i32, i32) {
    %c0_i32 = arith.constant 0 : i32
    %c0_i32_0 = arith.constant 0 : i32
    return %arg0, %arg1, %c0_i32 : i32, i32, i32
  }
}

module attributes {stable_mosaic.version = 11 : i64} {
  func.func @_ln_qkv_kernel(%arg0: i32, %arg1: i32, %arg2: memref<1x16x32xf32, #tpu.memory_space<vmem>>, %arg3: memref<1x32xf32, #tpu.memory_space<vmem>>, %arg4: memref<1x32xf32, #tpu.memory_space<vmem>>, %arg5: memref<32x96xbf16, #tpu.memory_space<vmem>>, %arg6: memref<1x96xf32, #tpu.memory_space<vmem>>, %arg7: memref<1x16x96xbf16, #tpu.memory_space<vmem>>) attributes {dimension_semantics = [#tpu.dimension_semantics<parallel>, #tpu.dimension_semantics<parallel>], iteration_bounds = array<i64: 2, 1>, scalar_prefetch = 0 : i64, scratch_operands = 0 : i64, tpu.core_type = #tpu.core_type<tc>, window_params = [{transform_indices = @transform_0, window_bounds = array<i64: 1, 16, 32>}, {pipeline_mode = #tpu.pipeline_mode<synchronous>, transform_indices = @transform_1, window_bounds = array<i64: 1, 32>}, {pipeline_mode = #tpu.pipeline_mode<synchronous>, transform_indices = @transform_2, window_bounds = array<i64: 1, 32>}, {pipeline_mode = #tpu.pipeline_mode<synchronous>, transform_indices = @transform_3, window_bounds = array<i64: 32, 96>}, {pipeline_mode = #tpu.pipeline_mode<synchronous>, transform_indices = @transform_4, window_bounds = array<i64: 1, 96>}, {transform_indices = @transform_5, window_bounds = array<i64: 1, 16, 96>}]} {
    %c0 = arith.constant 0 : index
    %c0_0 = arith.constant 0 : index
    %c0_1 = arith.constant 0 : index
    %0 = vector.load %arg2[%c0, %c0_0, %c0_1] : memref<1x16x32xf32, #tpu.memory_space<vmem>>, vector<1x16x32xf32>
    %1 = vector.shape_cast %0 : vector<1x16x32xf32> to vector<16x32xf32>
    %cst = arith.constant dense<0.000000e+00> : vector<16xf32>
    %2 = vector.multi_reduction <add>, %1, %cst [1] : vector<16x32xf32> to vector<16xf32>
    %3 = vector.shape_cast %2 : vector<16xf32> to vector<16x1xf32>
    %cst_2 = arith.constant 3.200000e+01 : f32
    %4 = vector.broadcast %cst_2 : f32 to vector<16x1xf32>
    %5 = arith.divf %3, %4 : vector<16x1xf32>
    %6 = vector.broadcast %5 : vector<16x1xf32> to vector<16x32xf32>
    %7 = arith.subf %1, %6 : vector<16x32xf32>
    %8 = arith.mulf %7, %7 : vector<16x32xf32>
    %cst_3 = arith.constant dense<0.000000e+00> : vector<16xf32>
    %9 = vector.multi_reduction <add>, %8, %cst_3 [1] : vector<16x32xf32> to vector<16xf32>
    %10 = vector.shape_cast %9 : vector<16xf32> to vector<16x1xf32>
    %cst_4 = arith.constant 3.200000e+01 : f32
    %11 = vector.broadcast %cst_4 : f32 to vector<16x1xf32>
    %12 = arith.divf %10, %11 : vector<16x1xf32>
    %13 = vector.broadcast %5 : vector<16x1xf32> to vector<16x32xf32>
    %14 = arith.subf %1, %13 : vector<16x32xf32>
    %cst_5 = arith.constant 9.99999974E-6 : f32
    %15 = vector.broadcast %cst_5 : f32 to vector<16x1xf32>
    %16 = arith.addf %12, %15 : vector<16x1xf32>
    %17 = math.rsqrt %16 : vector<16x1xf32>
    %18 = vector.broadcast %17 : vector<16x1xf32> to vector<16x32xf32>
    %19 = arith.mulf %14, %18 : vector<16x32xf32>
    %c0_6 = arith.constant 0 : index
    %c0_7 = arith.constant 0 : index
    %20 = vector.load %arg3[%c0_6, %c0_7] : memref<1x32xf32, #tpu.memory_space<vmem>>, vector<1x32xf32>
    %21 = vector.broadcast %20 : vector<1x32xf32> to vector<16x32xf32>
    %22 = arith.mulf %19, %21 : vector<16x32xf32>
    %c0_8 = arith.constant 0 : index
    %c0_9 = arith.constant 0 : index
    %23 = vector.load %arg4[%c0_8, %c0_9] : memref<1x32xf32, #tpu.memory_space<vmem>>, vector<1x32xf32>
    %24 = vector.broadcast %23 : vector<1x32xf32> to vector<16x32xf32>
    %25 = arith.addf %22, %24 : vector<16x32xf32>
    %26 = arith.truncf %25 : vector<16x32xf32> to vector<16x32xbf16>
    %c0_10 = arith.constant 0 : index
    %c0_11 = arith.constant 0 : index
    %27 = vector.load %arg5[%c0_10, %c0_11] : memref<32x96xbf16, #tpu.memory_space<vmem>>, vector<32x96xbf16>
    %cst_12 = arith.constant dense<0.000000e+00> : vector<16x96xf32>
    %28 = tpu.matmul %26, %27, %cst_12 {dimension_numbers = #tpu.dot_dimension_numbers<[1], [0], [0], [1], [0, 0, 1, 1], [], []>} : vector<16x32xbf16>, vector<32x96xbf16>, vector<16x96xf32> -> vector<16x96xf32>
    %c0_13 = arith.constant 0 : index
    %c0_14 = arith.constant 0 : index
    %29 = vector.load %arg6[%c0_13, %c0_14] : memref<1x96xf32, #tpu.memory_space<vmem>>, vector<1x96xf32>
    %30 = vector.broadcast %29 : vector<1x96xf32> to vector<16x96xf32>
    %31 = arith.addf %28, %30 : vector<16x96xf32>
    %32 = arith.truncf %31 : vector<16x96xf32> to vector<16x96xbf16>
    %c0_15 = arith.constant 0 : index
    %c0_16 = arith.constant 0 : index
    %c0_17 = arith.constant 0 : index
    %33 = vector.load %arg7[%c0_15, %c0_16, %c0_17] : memref<1x16x96xbf16, #tpu.memory_space<vmem>>, vector<1x16x96xbf16>
    %34 = vector.shape_cast %33 : vector<1x16x96xbf16> to vector<16x96xbf16>
    %35 = vector.shape_cast %32 : vector<16x96xbf16> to vector<1x16x96xbf16>
    tpu.vector_store %arg7[%c0_15, %c0_16, %c0_17], %35 {strides = array<i32>} : memref<1x16x96xbf16, #tpu.memory_space<vmem>>, vector<1x16x96xbf16>,
    return
  }
  func.func @transform_0(%arg0: i32, %arg1: i32) -> (i32, i32, i32) {
    %c0_i32 = arith.constant 0 : i32
    %c0_i32_0 = arith.constant 0 : i32
    return %arg0, %arg1, %c0_i32 : i32, i32, i32
  }
  func.func @transform_1(%arg0: i32, %arg1: i32) -> (i32, i32) {
    %c0_i32 = arith.constant 0 : i32
    %c0_i32_0 = arith.constant 0 : i32
    %c0_i32_1 = arith.constant 0 : i32
    return %c0_i32, %c0_i32_0 : i32, i32
  }
  func.func @transform_2(%arg0: i32, %arg1: i32) -> (i32, i32) {
    %c0_i32 = arith.constant 0 : i32
    %c0_i32_0 = arith.constant 0 : i32
    %c0_i32_1 = arith.constant 0 : i32
    return %c0_i32, %c0_i32_0 : i32, i32
  }
  func.func @transform_3(%arg0: i32, %arg1: i32) -> (i32, i32) {
    %c0_i32 = arith.constant 0 : i32
    %c0_i32_0 = arith.constant 0 : i32
    %c0_i32_1 = arith.constant 0 : i32
    return %c0_i32, %c0_i32_0 : i32, i32
  }
  func.func @transform_4(%arg0: i32, %arg1: i32) -> (i32, i32) {
    %c0_i32 = arith.constant 0 : i32
    %c0_i32_0 = arith.constant 0 : i32
    %c0_i32_1 = arith.constant 0 : i32
    return %c0_i32, %c0_i32_0 : i32, i32
  }
  func.func @transform_5(%arg0: i32, %arg1: i32) -> (i32, i32, i32) {
    %c0_i32 = arith.constant 0 : i32
    %c0_i32_0 = arith.constant 0 : i32
    return %arg0, %arg1, %c0_i32 : i32, i32, i32
  }
}

</mosaic_0001>

<bundles_post_ra>
// kernel: tpu_custom_call.1
= control target key start
LH: loop header
LB: loop body
LE: loop exit
PB: predicated region body
PF: predicated region fallthrough
CT: control target
= control target key end

     0   :  { %10 = vsyncpa [#allocation3], 0  ;;  %s1067_s0 = inlined_call_operand.hbm [shape: f32[2,16,32], index: 0, kind: input, shape index: {}]   ;;  %s1068_s1 = inlined_call_operand.vmem [shape: f32[1,32], index: 1, kind: input, shape index: {}]   ;;  %s1069_s2 = inlined_call_operand.vmem [shape: f32[1,32], index: 2, kind: input, shape index: {}]   ;;  %s1070_s3 = inlined_call_operand.hbm [shape: bf16[32,96], index: 3, kind: input, shape index: {}]   ;;  %s1071_s4 = inlined_call_operand.vmem [shape: f32[1,96], index: 4, kind: input, shape index: {}]   ;;  %s1072_s5 = inlined_call_operand.hbm [shape: bf16[2,16,96], index: 5, kind: output, shape index: {}]  }
   0x1   :  { %12 = vsyncpa [#allocation3 + $0x1], 0 }
   0x2   :  { %13 = vsyncpa [#allocation6], 0 }
   0x3   :  { %14 = vsyncpa [#allocation4], 0 }
   0x4   :  { %16 = vsyncpa [#allocation4 + $0x1], 0  ;;  %s833_s18 = smov 0   ;;  %s835_s19 = smov 0  }
   0x5   :  { %s837_s20 = smov 0   ;;  %s839_s21 = smov 0  }
   0x6   :  { %s841_s22 = smov 0   ;;  %s843_s23 = smov 0  }
   0x7 LB: > { %s519_s24 = sadd.s32 4294967295, %s790_s23   ;;  %s520_s25 = sadd.s32 4294967294, %s790_s23   ;;  %s790_s23 = sphi %s843_s23, %s22_s23   ;;  %s786_s22 = sphi %s841_s22, %s1096_s22   ;;  %s782_s21 = sphi %s839_s21, %s1095_s21   ;;  %s778_s20 = sphi %s837_s20, %s1094_s20   ;;  %s774_s19 = sphi %s835_s19, %s1093_s19   ;;  %s770_s18 = sphi %s833_s18, %s1092_s18  }
   0x8   : > { %p56_p0 = scmp.ne.s32.totalorder %s774_s19, %s770_s18  ;;  %p867_p1 = scmp.eq.s32.totalorder %s519_s24, 0 }
   0x9   : > { %p871_p2 = scmp.eq.s32.totalorder %s519_s24, 1  ;;  %p172_p3 = scmp.eq.s32.totalorder %s520_s25, 1 }
   0xa   : > { %s1077_s26 = scalar_select %p867_p1, 1, 0 }
   0xb   : > { %s1078_s27 = scalar_select %p871_p2, 1, 0 }
   0xc   : > { %p877_p4 = por %p867_p1, %p56_p0  ;;  %p521_p5 = scmp.ge.s32.totalorder %s790_s23, 1 }
   0xd   : > { %p882_p6 = por %p172_p3, %p56_p0  ;;  %p179_p7 = scmp.lt.s32.totalorder %s790_s23, 3 }
   0xe   : > { %s1079_s28 = scalar_select %p877_p4, 1, 0 }
   0xf   : > { %s1080_s29 = scalar_select %p882_p6, 1, 0 }
  0x10   : > { %p887_p8 = pnand %p521_p5, %p179_p7  ;;  %s792_s6 = smov [#allocation5]  }
  0x11   : > { %s197_s7 = sshll.u32 %s792_s6, 4  ;;  %s34_s9 = sadd.s32 1, %s786_s22  ;;  %s198_s7 = int_to_ptr.vmem [resolvable:$true] %s197_s7 }
  0x12   : > { %s1081_s30 = scalar_select %p887_p8, 1, 0 }
  0x13   : > { %p567_p9 = pneg %p887_p8  ;;  %s646_s12 = scalar_lea.hbm %s1070_s3, 256 }
  0x14   : > { %p647_p12 = scmp.ne.s32.totalorder %s1070_s3, %s646_s12  ;;  %p653_p5 = scmp.lt.u32.totalorder %s646_s12, %s1070_s3 }
  0x15   : > { %p896_p11 = pnand %p567_p9, %p867_p1 }
  0x17   : > { %p648_p13 = pneg %p896_p11 }
  0x19   : > { %p649_p0 = pnand %p648_p13, %p647_p12 }
  0x1b   : > { %p650_p3 = pneg %p649_p0 }
  0x1d   : > { %p655_p7 = pnand %p653_p5, %p650_p3 }
  0x1f   : > { %658 = shalt.err (!%p655_p7)
}
  0x20   : > { %s659_s17 = scalar_lea.vmem %s198_s7, 256  ;;  %p667_p1 = scmp.lt.s32.totalorder %s198_s7, %s198_s7 }
  0x21   : > { %p660_p9 = scmp.ne.s32.totalorder %s198_s7, %s659_s17  ;;  %p668_p4 = scmp.lt.s32.totalorder %s659_s17, %s659_s17 }
  0x23   : > { %p662_p10 = pnand %p660_p9, %p648_p13  ;;  %p669_p8 = por %p668_p4, %p667_p1 }
  0x25   : > { %p663_p6 = pneg %p662_p10 }
  0x27   : > { %p670_p2 = pnand %p669_p8, %p663_p6 }
  0x29   : > { %673 = shalt.err (!%p670_p2)
}
  0x2a   : > { %s793_s24 = smov 64   ;;  %s794_s25 = smov 4  }
  0x2b   : > { %570 = dma.hbm_to_vmem [thread:$0]  (!%p896_p11), %s1070_s3, 256, %s198_s7, [#allocation6], %s793_s24, %s793_s24, %s794_s25  }
  0x2c   : > { %p36_p1 = scmp.ge.s32.totalorder %s34_s9, 2  ;;  %s43_s11 = sadd.s32 1, %s778_s20 }
  0x2d   : > { %p50_p2 = scmp.ne.s32.totalorder %s778_s20, %s774_s19  ;;  %p51_p4 = scmp.eq.s32.totalorder %s790_s23, 0 }
  0x2e   : > { %s1098_s9 = smov (%p36_p1, %s34_s9), 0  ;;  %p1084_p8 = scmp.ne.s32.totalorder %s1078_s27, 0 }
  0x2f   : > { %p923_p6 = por %p51_p4, %p50_p2  ;;  %s38_s8 = ssub.s32 %s786_s22, %s1098_s9 }
  0x30   : > { %p929_p10 = por %p1084_p8, %p50_p2  ;;  %p580_p12 = scmp.lt.s32.totalorder %s790_s23, 2 }
  0x31   : > { %p41_p11 = scmp.eq.s32.totalorder %s38_s8, 0  ;;  %s214_s7 = sand.u32 1, %s778_s20  }
  0x32   : > { %s524_s14 = sshll.u32 %s214_s7, 4  ;;  %s544_s16 = sshll.u32 %s786_s22, 8 }
  0x33   : > { %s938_s15 = scalar_select %p41_p11, %s778_s20, %s43_s11  }
  0x34   : > { %s944_s25 = scalar_lea.hbm %s1067_s0, %s544_s16  ;;  %s218_s27 = scalar_lea.vmem [#allocation2], %s524_s14 }
  0x35   : > { %s227_s6 = sshll.u32 %s218_s27, 4  ;;  %p950_p13 = pnand %p580_p12, %p923_p6  ;;  %s946_s6 = int_to_ptr.vmem [resolvable:$true] %s227_s6 }
  0x36   : > { %s954_s11 = scalar_lea.sflag [#allocation3], %s214_s7  ;;  %s674_s8 = scalar_lea.hbm %s944_s25, 256 }
  0x37   : > { %p675_p0 = scmp.ne.s32.totalorder %s944_s25, %s674_s8  ;;  %p676_p3 = pneg %p950_p13 }
  0x38   : > { %s679_s12 = scalar_lea.hbm %s1067_s0, 512  ;;  %p680_p9 = scmp.lt.u32.totalorder %s944_s25, %s1067_s0 }
  0x39   : > { %p677_p5 = pnand %p676_p3, %p675_p0  ;;  %p681_p1 = scmp.lt.u32.totalorder %s679_s12, %s674_s8 }
  0x3a   : > { %p683_p4 = scmp.lt.u32.totalorder %s674_s8, %s944_s25 }
  0x3b   : > { %p678_p7 = pneg %p677_p5  ;;  %p682_p2 = por %p681_p1, %p680_p9 }
  0x3d   : > { %p684_p6 = por %p683_p4, %p682_p2 }
  0x3f   : > { %p685_p8 = pnand %p684_p6, %p678_p7 }
  0x41   : > { %688 = shalt.err (!%p685_p8)
}
  0x42   : > { %s689_s7 = scalar_lea.vmem %s946_s6, 256  ;;  %s795_s27 = smov [#allocation2]  }
  0x43   : > { %p690_p12 = scmp.ne.s32.totalorder %s946_s6, %s689_s7  ;;  %s694_s14 = sshll.u32 %s795_s27, 4  ;;  %s695_s14 = int_to_ptr.vmem [resolvable:$false] %s694_s14 }
  0x44   : > { %s696_s16 = scalar_lea.vmem %s695_s14, 512  ;;  %p697_p5 = scmp.lt.s32.totalorder %s946_s6, %s695_s14 }
  0x45   : > { %p692_p11 = pnand %p690_p12, %p676_p3  ;;  %p698_p9 = scmp.lt.s32.totalorder %s696_s16, %s689_s7 }
  0x47   : > { %p693_p0 = pneg %p692_p11  ;;  %p699_p1 = por %p698_p9, %p697_p5 }
  0x49   : > { %p700_p2 = pnand %p699_p1, %p693_p0 }
  0x4b   : > { %703 = shalt.err (!%p700_p2)
}
  0x4c   : > { %s796_s8 = smov 128   ;;  %s797_s12 = smov 8  }
  0x4d   : > { %574 = dma.hbm_to_vmem [thread:$0]  (!%p950_p13), %s944_s25, 256, %s946_s6, %s954_s11, %s796_s8, %s796_s8, %s797_s12  }
  0x4e   : > { %p1087_p3 = scmp.ne.s32.totalorder %s1081_s30, 0 }
  0x4f   : > { %s985_s17 = sand.u32 (!%p1087_p3), 1, %s774_s19   ;;  %p1088_p7 = scmp.ne.s32.totalorder (!%p1087_p3), %s1079_s28, 0 }
  0x50   : > { %239 = sbr.rel (%p1087_p3) target bundleno = 644 (0x284), region = 40  ;;  %s528_s24 = sshll.u32 (!%p1087_p3), %s985_s17, 4 }
  0x51   : > { %s242_s7 = scalar_lea.sflag (!%p1087_p3), [#allocation3], %s985_s17  ;;  %s245_s27 = scalar_lea.vmem (!%p1087_p3), [#allocation2], %s528_s24 }
  0x57   : > { %757 = dma.done.wait (%p1088_p7), %s242_s7, 256  }
  0x58   : > { %759 = vsyncadd (%p1088_p7), %s242_s7, 4294967040  ;;  %p1089_p4 = scmp.ne.s32.totalorder %s1077_s26, 0 }
  0x5a   : > { %761 = dma.done.wait (%p1089_p4), [#allocation6], 256  }
  0x5b   : > { %763 = vsyncadd (%p1089_p4), [#allocation6], 4294967040  ;;  %vm281_vm0 = vcmask 261120   ;;  %v279_v0 = vld [vmem:[%s245_s27] sm:$0xff]  ;;  %v280_v1 = vld [vmem:[%s245_s27 + $0x8] sm:$0xff]  ;;  %v798_v15 = vmov 0.0  }
  0x5c   : > { %v282_v2 = vsel %vm281_vm0, %v279_v0, 0.0  ;;  %v285_v3 = vsel %vm281_vm0, %v280_v1, 0.0  ;;  %v640_v14 = vld [vmem:[#allocation5] sm:$0xff]   ;;  %551 = vmatprep.subr.bf16.mxu0 %v798_v15  ;;  %v641_v16 = vld [vmem:[#allocation5 + $0x8] sm:$0xff]   ;;  %vm799_vm1 = vmmov 0   ;;  %s530_s6 = sshll.u32 %s985_s17, 3 }
  0x5d   : > { %283 = vadd.xlane.f32.xlu0 %v282_v2  ;;  %552 = vmatpush3.bf16.msra.mxu0 %v640_v14  ;;  %v531_v25 = vld [vmem:[%s1068_s1] ss:$0 sm:$0xff]  ;;  %s275_s14 = scalar_lea.vmem [#allocation7], %s530_s6  ;;  %s547_s8 = sshll.u32 %s782_s21, 7  ;;  %vm403_vm2 = vcmask 781312  }
  0x5e   : > { %555 = vmatprep.mubr.msk.bf16.mxu0 %vm799_vm1, %v798_v15  ;;  %553 = vmatprep.subr.bf16.mxu0 %v798_v15  ;;  %v532_v29 = vld [vmem:[%s1069_s2] ss:$0 sm:$0xff]  ;;  %s422_s16 = sshll.u32 %s275_s14, 4  ;;  %s1016_s7 = scalar_lea.hbm %s1072_s5, %s547_s8  ;;  %s1018_s16 = int_to_ptr.vmem [resolvable:$true] %s422_s16 }
  0x5f   : > { %v533_v34 = vld [vmem:[%s1071_s4] ss:$0 sm:$0xff]  ;;  %s407_s27 = scalar_lea.sflag [#allocation4], %s985_s17  ;;  %s704_s21 = scalar_lea.vmem %s1018_s16, 128 }
  0x60   : > { %p705_p13 = scmp.ne.s32.totalorder %s1018_s16, %s704_s21  ;;  %s800_s26 = smov [#allocation7]  }
  0x61   : > { %286 = vadd.xlane.f32.xlu0 %v285_v3  ;;  %554 = vmatpush3.bf16.msra.mxu0 %v641_v16  ;;  %s708_s28 = sshll.u32 %s800_s26, 4  ;;  %s709_s28 = int_to_ptr.vmem [resolvable:$false] %s708_s28 }
  0x62   : > { %p706_p6 = pnand %p705_p13, %p929_p10  ;;  %s710_s30 = scalar_lea.vmem %s709_s28, 256 }
  0x63   : > { %p711_p12 = scmp.lt.s32.totalorder %s1018_s16, %s709_s28  ;;  %p712_p11 = scmp.lt.s32.totalorder %s710_s30, %s704_s21 }
  0x64   : > { %p707_p8 = pneg %p706_p6 }
  0x65   : > { %p713_p0 = por %p712_p11, %p711_p12 }
  0x67   : > { %p714_p5 = pnand %p713_p0, %p707_p8 }
  0xea   : > { %v284_v4 = vpop.xlane.xlu0 %283 }
  0xeb   : > { %v289_v5 = vmul.f32 0.03125, %v284_v4 }
  0xed   : > { %v291_v6 = vsub.f32 %v279_v0, %v289_v5 }
  0xee   : > { %v287_v7 = vpop.xlane.xlu0 %286 }
  0xef   : > { %v290_v8 = vmul.f32 0.03125, %v287_v7  ;;  %v293_v9 = vmul.f32 %v291_v6, %v291_v6 }
  0xf1   : > { %v292_v10 = vsub.f32 %v280_v1, %v290_v8  ;;  %v295_v11 = vsel %vm281_vm0, %v293_v9, 0.0 }
  0xf2   : > { %296 = vadd.xlane.f32.xlu1 %v295_v11 }
  0xf3   : > { %v294_v12 = vmul.f32 %v292_v10, %v292_v10 }
  0xf5   : > { %v298_v13 = vsel %vm281_vm0, %v294_v12, 0.0 }
  0xf6   : > { %299 = vadd.xlane.f32.xlu1 %v298_v13 }
 0x17f   : > { %v297_v17 = vpop.xlane.xlu1 %296 }
 0x180   : > { %v301_v18 = vmul.f32 0.03125, %v297_v17 }
 0x182   : > { %v303_v19 = vadd.f32 1e-05, %v301_v18 }
 0x183   : > { %v300_v20 = vpop.xlane.xlu1 %299 }
 0x184   : > { %642 = vrsqrt.f32 %v303_v19  ;;  %v302_v21 = vmul.f32 0.03125, %v300_v20 }
 0x186   : > { %v304_v22 = vadd.f32 1e-05, %v302_v21 }
 0x188   : > { %644 = vrsqrt.f32 %v304_v22 }
 0x18e   : > { %v643_v23 = vpop.eup %642 }
 0x18f   : > { %v307_v24 = vmul.f32 %v643_v23, %v291_v6 }
 0x191   : > { %v316_v28 = vmul.f32 %v531_v25, %v307_v24 }
 0x192   : > { %v645_v26 = vpop.eup %644 }
 0x193   : > { %v308_v27 = vmul.f32 %v645_v26, %v292_v10  ;;  %v325_v31 = vadd.f32 %v532_v29, %v316_v28 }
 0x195   : > { %v317_v30 = vmul.f32 %v531_v25, %v308_v27 }
 0x197   : > { %v326_v32 = vadd.f32 %v532_v29, %v317_v30 }
 0x199   : > { %v327_v33 = vpack.c.bf16 %v326_v32, %v325_v31 }
 0x19b   : > { %556 = vmatmul.mubr.msk.bf16.vlgmr.msra.gmra.mrb[0].mxu0 %vm281_vm0, %v327_v33 }
 0x26e   : > { %v388_v35 = vpop.f32.mrb[0].mxu0 }
 0x26f   : > { %v389_v36 = vadd.f32 %v533_v34, %v388_v35  ;;  %v557_v37 = vpop.f32.mrb[1].mxu0 }
 0x270   : > { %v391_v38 = vpop.f32.mrb[2].mxu0 }
 0x271   : > { %v545_v39 = vpack.c.bf16 %v389_v36, %v389_v36  ;;  %v392_v40 = vadd.f32 %v533_v34, %v391_v38  ;;  %v558_v41 = vpop.f32.mrb[3].mxu0 }
 0x273   : > { %404 = vst.msk [vmem:[%s275_s14] sm:$0xf] %vm403_vm2, %v545_v39  ;;  %v546_v42 = vpack.c.bf16 %v392_v40, %v392_v40 }
 0x275   : > { %405 = vst.msk [vmem:[%s275_s14 + $0x4] sm:$0xf] %vm403_vm2, %v546_v42 }
 0x276   : > { %717 = shalt.err (!%p714_p5)
}
 0x277   : > { %s718_s25 = scalar_lea.hbm %s1016_s7, 128  ;;  %s722_s11 = scalar_lea.hbm %s1072_s5, 256 }
 0x278   : > { %p719_p9 = scmp.ne.s32.totalorder %s1016_s7, %s718_s25  ;;  %p723_p3 = scmp.lt.u32.totalorder %s1016_s7, %s1072_s5 }
 0x279   : > { %p724_p7 = scmp.lt.u32.totalorder %s722_s11, %s718_s25  ;;  %p726_p13 = scmp.lt.u32.totalorder %s718_s25, %s1016_s7 }
 0x27a   : > { %p720_p1 = pnand %p719_p9, %p929_p10 }
 0x27b   : > { %p725_p4 = por %p724_p7, %p723_p3 }
 0x27c   : > { %p721_p2 = pneg %p720_p1 }
 0x27d   : > { %p727_p6 = por %p726_p13, %p725_p4 }
 0x27f   : > { %p728_p8 = pnand %p727_p6, %p721_p2 }
 0x281   : > { %731 = shalt.err (!%p728_p8)
}
 0x282   : > { %s801_s12 = smov 64   ;;  %s802_s24 = smov 4  }
 0x283   : > { %565 = dma.vmem_to_hbm [thread:$0]  (%p929_p10), %s1018_s16, 128, %s1016_s7, %s407_s27, %s801_s12, %s801_s12, %s802_s24  }
 0x284 PF: > { %s437_s21 = sand.u32 1, %s770_s18   ;;  %p1090_p12 = scmp.ne.s32.totalorder %s1080_s29, 0 }
 0x285   : > { %p1091_p11 = scmp.ge.s32.totalorder %s790_s23, 2  ;;  %s438_s26 = scalar_lea.sflag [#allocation4], %s437_s21 }
 0x287   : > { %p576_p0 = pnand %p1091_p11, %p1090_p12 }
 0x289   : > { %765 = dma.done.wait (!%p576_p0), %s438_s26, 128  }
 0x28a   : > { %767 = vsyncadd (!%p576_p0), %s438_s26, 4294967168  ;;  %s22_s23 = sadd.s32 1, %s790_s23   ;;  %s1092_s18 = smov %s774_s19 }
 0x28b   : > { %p19_p5 = scmp.ge.s32.totalorder %s22_s23, 4   ;;  %s1093_s19 = smov %s778_s20 }
 0x28c   : > { %s1094_s20 = smov %s938_s15  ;;  %s1095_s21 = smov %s786_s22 }
 0x28d   : > { %s1096_s22 = smov %s1098_s9  ;;  %21 = sbr.rel (!%p19_p5) target bundleno = 7 (0x7), region = 89 }
 0x294   :  { %443 = vsyncpa [#allocation3], 1 }
 0x295   :  { %445 = vsyncpa [#allocation3 + $0x1], 1 }
 0x296   :  { %446 = vsyncpa [#allocation6], 1 }
 0x297   :  { %447 = vsyncpa [#allocation4], 1 }
 0x298   :  { %449 = vsyncpa [#allocation4 + $0x1], 1 }

// kernel: tpu_custom_call.1
= control target key start
LH: loop header
LB: loop body
LE: loop exit
PB: predicated region body
PF: predicated region fallthrough
CT: control target
= control target key end

     0   :  { %10 = vsyncpa [#allocation3], 0  ;;  %s1067_s0 = inlined_call_operand.hbm [shape: f32[2,16,32], index: 0, kind: input, shape index: {}]   ;;  %s1068_s1 = inlined_call_operand.vmem [shape: f32[1,32], index: 1, kind: input, shape index: {}]   ;;  %s1069_s2 = inlined_call_operand.vmem [shape: f32[1,32], index: 2, kind: input, shape index: {}]   ;;  %s1070_s3 = inlined_call_operand.hbm [shape: bf16[32,96], index: 3, kind: input, shape index: {}]   ;;  %s1071_s4 = inlined_call_operand.vmem [shape: f32[1,96], index: 4, kind: input, shape index: {}]   ;;  %s1072_s5 = inlined_call_operand.hbm [shape: bf16[2,16,96], index: 5, kind: output, shape index: {}]  }
   0x1   :  { %12 = vsyncpa [#allocation3 + $0x1], 0 }
   0x2   :  { %13 = vsyncpa [#allocation6], 0 }
   0x3   :  { %14 = vsyncpa [#allocation4], 0 }
   0x4   :  { %16 = vsyncpa [#allocation4 + $0x1], 0  ;;  %s833_s18 = smov 0   ;;  %s835_s19 = smov 0  }
   0x5   :  { %s837_s20 = smov 0   ;;  %s839_s21 = smov 0  }
   0x6   :  { %s841_s22 = smov 0   ;;  %s843_s23 = smov 0  }
   0x7 LB: > { %s519_s24 = sadd.s32 4294967295, %s790_s23   ;;  %s520_s25 = sadd.s32 4294967294, %s790_s23   ;;  %s790_s23 = sphi %s843_s23, %s22_s23   ;;  %s786_s22 = sphi %s841_s22, %s1096_s22   ;;  %s782_s21 = sphi %s839_s21, %s1095_s21   ;;  %s778_s20 = sphi %s837_s20, %s1094_s20   ;;  %s774_s19 = sphi %s835_s19, %s1093_s19   ;;  %s770_s18 = sphi %s833_s18, %s1092_s18  }
   0x8   : > { %p56_p0 = scmp.ne.s32.totalorder %s774_s19, %s770_s18  ;;  %p867_p1 = scmp.eq.s32.totalorder %s519_s24, 0 }
   0x9   : > { %p871_p2 = scmp.eq.s32.totalorder %s519_s24, 1  ;;  %p172_p3 = scmp.eq.s32.totalorder %s520_s25, 1 }
   0xa   : > { %s1077_s26 = scalar_select %p867_p1, 1, 0 }
   0xb   : > { %s1078_s27 = scalar_select %p871_p2, 1, 0 }
   0xc   : > { %p877_p4 = por %p867_p1, %p56_p0  ;;  %p521_p5 = scmp.ge.s32.totalorder %s790_s23, 1 }
   0xd   : > { %p882_p6 = por %p172_p3, %p56_p0  ;;  %p179_p7 = scmp.lt.s32.totalorder %s790_s23, 3 }
   0xe   : > { %s1079_s28 = scalar_select %p877_p4, 1, 0 }
   0xf   : > { %s1080_s29 = scalar_select %p882_p6, 1, 0 }
  0x10   : > { %p887_p8 = pnand %p521_p5, %p179_p7  ;;  %s792_s6 = smov [#allocation5]  }
  0x11   : > { %s197_s7 = sshll.u32 %s792_s6, 4  ;;  %s34_s9 = sadd.s32 1, %s786_s22  ;;  %s198_s7 = int_to_ptr.vmem [resolvable:$true] %s197_s7 }
  0x12   : > { %s1081_s30 = scalar_select %p887_p8, 1, 0 }
  0x13   : > { %p567_p9 = pneg %p887_p8  ;;  %s646_s12 = scalar_lea.hbm %s1070_s3, 256 }
  0x14   : > { %p647_p12 = scmp.ne.s32.totalorder %s1070_s3, %s646_s12  ;;  %p653_p5 = scmp.lt.u32.totalorder %s646_s12, %s1070_s3 }
  0x15   : > { %p896_p11 = pnand %p567_p9, %p867_p1 }
  0x17   : > { %p648_p13 = pneg %p896_p11 }
  0x19   : > { %p649_p0 = pnand %p648_p13, %p647_p12 }
  0x1b   : > { %p650_p3 = pneg %p649_p0 }
  0x1d   : > { %p655_p7 = pnand %p653_p5, %p650_p3 }
  0x1f   : > { %658 = shalt.err (!%p655_p7)
}
  0x20   : > { %s659_s17 = scalar_lea.vmem %s198_s7, 256  ;;  %p667_p1 = scmp.lt.s32.totalorder %s198_s7, %s198_s7 }
  0x21   : > { %p660_p9 = scmp.ne.s32.totalorder %s198_s7, %s659_s17  ;;  %p668_p4 = scmp.lt.s32.totalorder %s659_s17, %s659_s17 }
  0x23   : > { %p662_p10 = pnand %p660_p9, %p648_p13  ;;  %p669_p8 = por %p668_p4, %p667_p1 }
  0x25   : > { %p663_p6 = pneg %p662_p10 }
  0x27   : > { %p670_p2 = pnand %p669_p8, %p663_p6 }
  0x29   : > { %673 = shalt.err (!%p670_p2)
}
  0x2a   : > { %s793_s24 = smov 64   ;;  %s794_s25 = smov 4  }
  0x2b   : > { %570 = dma.hbm_to_vmem [thread:$0]  (!%p896_p11), %s1070_s3, 256, %s198_s7, [#allocation6], %s793_s24, %s793_s24, %s794_s25  }
  0x2c   : > { %p36_p1 = scmp.ge.s32.totalorder %s34_s9, 2  ;;  %s43_s11 = sadd.s32 1, %s778_s20 }
  0x2d   : > { %p50_p2 = scmp.ne.s32.totalorder %s778_s20, %s774_s19  ;;  %p51_p4 = scmp.eq.s32.totalorder %s790_s23, 0 }
  0x2e   : > { %s1098_s9 = smov (%p36_p1, %s34_s9), 0  ;;  %p1084_p8 = scmp.ne.s32.totalorder %s1078_s27, 0 }
  0x2f   : > { %p923_p6 = por %p51_p4, %p50_p2  ;;  %s38_s8 = ssub.s32 %s786_s22, %s1098_s9 }
  0x30   : > { %p929_p10 = por %p1084_p8, %p50_p2  ;;  %p580_p12 = scmp.lt.s32.totalorder %s790_s23, 2 }
  0x31   : > { %p41_p11 = scmp.eq.s32.totalorder %s38_s8, 0  ;;  %s214_s7 = sand.u32 1, %s778_s20  }
  0x32   : > { %s524_s14 = sshll.u32 %s214_s7, 4  ;;  %s544_s16 = sshll.u32 %s786_s22, 8 }
  0x33   : > { %s938_s15 = scalar_select %p41_p11, %s778_s20, %s43_s11  }
  0x34   : > { %s944_s25 = scalar_lea.hbm %s1067_s0, %s544_s16  ;;  %s218_s27 = scalar_lea.vmem [#allocation2], %s524_s14 }
  0x35   : > { %s227_s6 = sshll.u32 %s218_s27, 4  ;;  %p950_p13 = pnand %p580_p12, %p923_p6  ;;  %s946_s6 = int_to_ptr.vmem [resolvable:$true] %s227_s6 }
  0x36   : > { %s954_s11 = scalar_lea.sflag [#allocation3], %s214_s7  ;;  %s674_s8 = scalar_lea.hbm %s944_s25, 256 }
  0x37   : > { %p675_p0 = scmp.ne.s32.totalorder %s944_s25, %s674_s8  ;;  %p676_p3 = pneg %p950_p13 }
  0x38   : > { %s679_s12 = scalar_lea.hbm %s1067_s0, 512  ;;  %p680_p9 = scmp.lt.u32.totalorder %s944_s25, %s1067_s0 }
  0x39   : > { %p677_p5 = pnand %p676_p3, %p675_p0  ;;  %p681_p1 = scmp.lt.u32.totalorder %s679_s12, %s674_s8 }
  0x3a   : > { %p683_p4 = scmp.lt.u32.totalorder %s674_s8, %s944_s25 }
  0x3b   : > { %p678_p7 = pneg %p677_p5  ;;  %p682_p2 = por %p681_p1, %p680_p9 }
  0x3d   : > { %p684_p6 = por %p683_p4, %p682_p2 }
  0x3f   : > { %p685_p8 = pnand %p684_p6, %p678_p7 }
  0x41   : > { %688 = shalt.err (!%p685_p8)
}
  0x42   : > { %s689_s7 = scalar_lea.vmem %s946_s6, 256  ;;  %s795_s27 = smov [#allocation2]  }
  0x43   : > { %p690_p12 = scmp.ne.s32.totalorder %s946_s6, %s689_s7  ;;  %s694_s14 = sshll.u32 %s795_s27, 4  ;;  %s695_s14 = int_to_ptr.vmem [resolvable:$false] %s694_s14 }
  0x44   : > { %s696_s16 = scalar_lea.vmem %s695_s14, 512  ;;  %p697_p5 = scmp.lt.s32.totalorder %s946_s6, %s695_s14 }
  0x45   : > { %p692_p11 = pnand %p690_p12, %p676_p3  ;;  %p698_p9 = scmp.lt.s32.totalorder %s696_s16, %s689_s7 }
  0x47   : > { %p693_p0 = pneg %p692_p11  ;;  %p699_p1 = por %p698_p9, %p697_p5 }
  0x49   : > { %p700_p2 = pnand %p699_p1, %p693_p0 }
  0x4b   : > { %703 = shalt.err (!%p700_p2)
}
  0x4c   : > { %s796_s8 = smov 128   ;;  %s797_s12 = smov 8  }
  0x4d   : > { %574 = dma.hbm_to_vmem [thread:$0]  (!%p950_p13), %s944_s25, 256, %s946_s6, %s954_s11, %s796_s8, %s796_s8, %s797_s12  }
  0x4e   : > { %p1087_p3 = scmp.ne.s32.totalorder %s1081_s30, 0 }
  0x4f   : > { %s985_s17 = sand.u32 (!%p1087_p3), 1, %s774_s19   ;;  %p1088_p7 = scmp.ne.s32.totalorder (!%p1087_p3), %s1079_s28, 0 }
  0x50   : > { %239 = sbr.rel (%p1087_p3) target bundleno = 644 (0x284), region = 40  ;;  %s528_s24 = sshll.u32 (!%p1087_p3), %s985_s17, 4 }
  0x51   : > { %s242_s7 = scalar_lea.sflag (!%p1087_p3), [#allocation3], %s985_s17  ;;  %s245_s27 = scalar_lea.vmem (!%p1087_p3), [#allocation2], %s528_s24 }
  0x57   : > { %757 = dma.done.wait (%p1088_p7), %s242_s7, 256  }
  0x58   : > { %759 = vsyncadd (%p1088_p7), %s242_s7, 4294967040  ;;  %p1089_p4 = scmp.ne.s32.totalorder %s1077_s26, 0 }
  0x5a   : > { %761 = dma.done.wait (%p1089_p4), [#allocation6], 256  }
  0x5b   : > { %763 = vsyncadd (%p1089_p4), [#allocation6], 4294967040  ;;  %vm281_vm0 = vcmask 261120   ;;  %v279_v0 = vld [vmem:[%s245_s27] sm:$0xff]  ;;  %v280_v1 = vld [vmem:[%s245_s27 + $0x8] sm:$0xff]  ;;  %v798_v15 = vmov 0.0  }
  0x5c   : > { %v282_v2 = vsel %vm281_vm0, %v279_v0, 0.0  ;;  %v285_v3 = vsel %vm281_vm0, %v280_v1, 0.0  ;;  %v640_v14 = vld [vmem:[#allocation5] sm:$0xff]   ;;  %551 = vmatprep.subr.bf16.mxu0 %v798_v15  ;;  %v641_v16 = vld [vmem:[#allocation5 + $0x8] sm:$0xff]   ;;  %vm799_vm1 = vmmov 0   ;;  %s530_s6 = sshll.u32 %s985_s17, 3 }
  0x5d   : > { %283 = vadd.xlane.f32.xlu0 %v282_v2  ;;  %552 = vmatpush3.bf16.msra.mxu0 %v640_v14  ;;  %v531_v25 = vld [vmem:[%s1068_s1] ss:$0 sm:$0xff]  ;;  %s275_s14 = scalar_lea.vmem [#allocation7], %s530_s6  ;;  %s547_s8 = sshll.u32 %s782_s21, 7  ;;  %vm403_vm2 = vcmask 781312  }
  0x5e   : > { %555 = vmatprep.mubr.msk.bf16.mxu0 %vm799_vm1, %v798_v15  ;;  %553 = vmatprep.subr.bf16.mxu0 %v798_v15  ;;  %v532_v29 = vld [vmem:[%s1069_s2] ss:$0 sm:$0xff]  ;;  %s422_s16 = sshll.u32 %s275_s14, 4  ;;  %s1016_s7 = scalar_lea.hbm %s1072_s5, %s547_s8  ;;  %s1018_s16 = int_to_ptr.vmem [resolvable:$true] %s422_s16 }
  0x5f   : > { %v533_v34 = vld [vmem:[%s1071_s4] ss:$0 sm:$0xff]  ;;  %s407_s27 = scalar_lea.sflag [#allocation4], %s985_s17  ;;  %s704_s21 = scalar_lea.vmem %s1018_s16, 128 }
  0x60   : > { %p705_p13 = scmp.ne.s32.totalorder %s1018_s16, %s704_s21  ;;  %s800_s26 = smov [#allocation7]  }
  0x61   : > { %286 = vadd.xlane.f32.xlu0 %v285_v3  ;;  %554 = vmatpush3.bf16.msra.mxu0 %v641_v16  ;;  %s708_s28 = sshll.u32 %s800_s26, 4  ;;  %s709_s28 = int_to_ptr.vmem [resolvable:$false] %s708_s28 }
  0x62   : > { %p706_p6 = pnand %p705_p13, %p929_p10  ;;  %s710_s30 = scalar_lea.vmem %s709_s28, 256 }
  0x63   : > { %p711_p12 = scmp.lt.s32.totalorder %s1018_s16, %s709_s28  ;;  %p712_p11 = scmp.lt.s32.totalorder %s710_s30, %s704_s21 }
  0x64   : > { %p707_p8 = pneg %p706_p6 }
  0x65   : > { %p713_p0 = por %p712_p11, %p711_p12 }
  0x67   : > { %p714_p5 = pnand %p713_p0, %p707_p8 }
  0xea   : > { %v284_v4 = vpop.xlane.xlu0 %283 }
  0xeb   : > { %v289_v5 = vmul.f32 0.03125, %v284_v4 }
  0xed   : > { %v291_v6 = vsub.f32 %v279_v0, %v289_v5 }
  0xee   : > { %v287_v7 = vpop.xlane.xlu0 %286 }
  0xef   : > { %v290_v8 = vmul.f32 0.03125, %v287_v7  ;;  %v293_v9 = vmul.f32 %v291_v6, %v291_v6 }
  0xf1   : > { %v292_v10 = vsub.f32 %v280_v1, %v290_v8  ;;  %v295_v11 = vsel %vm281_vm0, %v293_v9, 0.0 }
  0xf2   : > { %296 = vadd.xlane.f32.xlu1 %v295_v11 }
  0xf3   : > { %v294_v12 = vmul.f32 %v292_v10, %v292_v10 }
  0xf5   : > { %v298_v13 = vsel %vm281_vm0, %v294_v12, 0.0 }
  0xf6   : > { %299 = vadd.xlane.f32.xlu1 %v298_v13 }
 0x17f   : > { %v297_v17 = vpop.xlane.xlu1 %296 }
 0x180   : > { %v301_v18 = vmul.f32 0.03125, %v297_v17 }
 0x182   : > { %v303_v19 = vadd.f32 1e-05, %v301_v18 }
 0x183   : > { %v300_v20 = vpop.xlane.xlu1 %299 }
 0x184   : > { %642 = vrsqrt.f32 %v303_v19  ;;  %v302_v21 = vmul.f32 0.03125, %v300_v20 }
 0x186   : > { %v304_v22 = vadd.f32 1e-05, %v302_v21 }
 0x188   : > { %644 = vrsqrt.f32 %v304_v22 }
 0x18e   : > { %v643_v23 = vpop.eup %642 }
 0x18f   : > { %v307_v24 = vmul.f32 %v643_v23, %v291_v6 }
 0x191   : > { %v316_v28 = vmul.f32 %v531_v25, %v307_v24 }
 0x192   : > { %v645_v26 = vpop.eup %644 }
 0x193   : > { %v308_v27 = vmul.f32 %v645_v26, %v292_v10  ;;  %v325_v31 = vadd.f32 %v532_v29, %v316_v28 }
 0x195   : > { %v317_v30 = vmul.f32 %v531_v25, %v308_v27 }
 0x197   : > { %v326_v32 = vadd.f32 %v532_v29, %v317_v30 }
 0x199   : > { %v327_v33 = vpack.c.bf16 %v326_v32, %v325_v31 }
 0x19b   : > { %556 = vmatmul.mubr.msk.bf16.vlgmr.msra.gmra.mrb[0].mxu0 %vm281_vm0, %v327_v33 }
 0x26e   : > { %v388_v35 = vpop.f32.mrb[0].mxu0 }
 0x26f   : > { %v389_v36 = vadd.f32 %v533_v34, %v388_v35  ;;  %v557_v37 = vpop.f32.mrb[1].mxu0 }
 0x270   : > { %v391_v38 = vpop.f32.mrb[2].mxu0 }
 0x271   : > { %v545_v39 = vpack.c.bf16 %v389_v36, %v389_v36  ;;  %v392_v40 = vadd.f32 %v533_v34, %v391_v38  ;;  %v558_v41 = vpop.f32.mrb[3].mxu0 }
 0x273   : > { %404 = vst.msk [vmem:[%s275_s14] sm:$0xf] %vm403_vm2, %v545_v39  ;;  %v546_v42 = vpack.c.bf16 %v392_v40, %v392_v40 }
 0x275   : > { %405 = vst.msk [vmem:[%s275_s14 + $0x4] sm:$0xf] %vm403_vm2, %v546_v42 }
 0x276   : > { %717 = shalt.err (!%p714_p5)
}
 0x277   : > { %s718_s25 = scalar_lea.hbm %s1016_s7, 128  ;;  %s722_s11 = scalar_lea.hbm %s1072_s5, 256 }
 0x278   : > { %p719_p9 = scmp.ne.s32.totalorder %s1016_s7, %s718_s25  ;;  %p723_p3 = scmp.lt.u32.totalorder %s1016_s7, %s1072_s5 }
 0x279   : > { %p724_p7 = scmp.lt.u32.totalorder %s722_s11, %s718_s25  ;;  %p726_p13 = scmp.lt.u32.totalorder %s718_s25, %s1016_s7 }
 0x27a   : > { %p720_p1 = pnand %p719_p9, %p929_p10 }
 0x27b   : > { %p725_p4 = por %p724_p7, %p723_p3 }
 0x27c   : > { %p721_p2 = pneg %p720_p1 }
 0x27d   : > { %p727_p6 = por %p726_p13, %p725_p4 }
 0x27f   : > { %p728_p8 = pnand %p727_p6, %p721_p2 }
 0x281   : > { %731 = shalt.err (!%p728_p8)
}
 0x282   : > { %s801_s12 = smov 64   ;;  %s802_s24 = smov 4  }
 0x283   : > { %565 = dma.vmem_to_hbm [thread:$0]  (%p929_p10), %s1018_s16, 128, %s1016_s7, %s407_s27, %s801_s12, %s801_s12, %s802_s24  }
 0x284 PF: > { %s437_s21 = sand.u32 1, %s770_s18   ;;  %p1090_p12 = scmp.ne.s32.totalorder %s1080_s29, 0 }
 0x285   : > { %p1091_p11 = scmp.ge.s32.totalorder %s790_s23, 2  ;;  %s438_s26 = scalar_lea.sflag [#allocation4], %s437_s21 }
 0x287   : > { %p576_p0 = pnand %p1091_p11, %p1090_p12 }
 0x289   : > { %765 = dma.done.wait (!%p576_p0), %s438_s26, 128  }
 0x28a   : > { %767 = vsyncadd (!%p576_p0), %s438_s26, 4294967168  ;;  %s22_s23 = sadd.s32 1, %s790_s23   ;;  %s1092_s18 = smov %s774_s19 }
 0x28b   : > { %p19_p5 = scmp.ge.s32.totalorder %s22_s23, 4   ;;  %s1093_s19 = smov %s778_s20 }
 0x28c   : > { %s1094_s20 = smov %s938_s15  ;;  %s1095_s21 = smov %s786_s22 }
 0x28d   : > { %s1096_s22 = smov %s1098_s9  ;;  %21 = sbr.rel (!%p19_p5) target bundleno = 7 (0x7), region = 89 }
 0x294   :  { %443 = vsyncpa [#allocation3], 1 }
 0x295   :  { %445 = vsyncpa [#allocation3 + $0x1], 1 }
 0x296   :  { %446 = vsyncpa [#allocation6], 1 }
 0x297   :  { %447 = vsyncpa [#allocation4], 1 }
 0x298   :  { %449 = vsyncpa [#allocation4 + $0x1], 1 }

</bundles_post_ra>
